<compile_context>
chip_gen: v7x
topology: tpu7x:2x2x1
jax: 0.10.0
libtpu: 0.0.40
codegen_flags: <defaults>
</compile_context>

<pallas_src>
import jax
import jax.numpy as jnp
from jax.experimental import pallas as pl
from jax.experimental.pallas import tpu as pltpu


def _round_up(x, m):
    return ((x + m - 1) // m) * m


def _linear_kernel(x_ref, wt_ref, b_ref, o_ref):
    # x_ref: (TM, F) VMEM; wt_ref: (F, 1) VMEM; b_ref: (1, 1) SMEM; o_ref: (TM, 1) VMEM.
    x = x_ref[...].astype(jnp.float32)
    wt = wt_ref[...].astype(jnp.float32)
    # F-contraction on the MXU (idle otherwise); f32 accumulation.
    y = jnp.dot(x, wt, preferred_element_type=jnp.float32)   # (TM, 1)
    o_ref[...] = (y + b_ref[0, 0]).astype(o_ref.dtype)


def linear_forward(x, w, b, *, block_rows=None,
                   vmem_budget_bytes=24 * 1024 * 1024):
    """Pallas equivalent of LinearNet.forward.

    x: (B, F) float32 or bfloat16
    w: (1, F) torch weight layout (out_features=1, in_features=F)
    b: ()     scalar bias
    returns (B, 1) float32
    """
    B, F = x.shape
    assert w.shape == (1, F)

    itemsize = jnp.dtype(x.dtype).itemsize
    F_pad = _round_up(F, 128)  # lane padding of the x tile in VMEM
    # Double-buffered per-row VMEM footprint: lane-padded x row + lane-padded
    # (TM, 1) f32 output row (pads to 128 lanes).
    per_row_db = 2 * (F_pad * itemsize + 128 * 4)

    if block_rows is None:
        block_rows = max(8, vmem_budget_bytes // per_row_db)
        # Keep >= 4 grid steps when the batch allows it, so the "parallel"
        # batch axis can shard across both TensorCores on v7x and still
        # pipeline within each core.
        block_rows = min(block_rows, max(8, _round_up(pl.cdiv(B, 4), 8)))

    # Row tile: multiple of 8 (sublane constraint), no larger than padded batch.
    TM = max(8, (min(block_rows, _round_up(B, 8)) // 8) * 8)
    grid = pl.cdiv(B, TM)  # ragged last block; no wrapper-side pad / extra HBM pass

    # Explicit scoped-VMEM limit (raises v5e's 16 MiB default; safe on v7x).
    vmem_need = TM * per_row_db + 2 * F_pad * 4 + (2 << 20)
    vmem_limit = int(min(64 << 20, max(32 << 20, vmem_need)))

    wt = jnp.transpose(w)                       # (F, 1) for the MXU contraction
    b2 = jnp.reshape(b, (1, 1)).astype(jnp.float32)

    out = pl.pallas_call(
        _linear_kernel,
        out_shape=jax.ShapeDtypeStruct((B, 1), jnp.float32),
        grid_spec=pltpu.PrefetchScalarGridSpec(
            num_scalar_prefetch=0,
            grid=(grid,),
            in_specs=[
                pl.BlockSpec((TM, F), lambda i: (i, 0)),   # x row tile (streamed)
                pl.BlockSpec((F, 1), lambda i: (0, 0)),    # weight column (resident)
                pl.BlockSpec(memory_space=pltpu.SMEM),     # bias scalar in SMEM
            ],
            out_specs=pl.BlockSpec((TM, 1), lambda i: (i, 0)),
        ),
        compiler_params=pltpu.CompilerParams(
            dimension_semantics=("parallel",),
            vmem_limit_bytes=vmem_limit,
        ),
    )(x, wt, b2)
    return out


if __name__ == "__main__":
    key = jax.random.PRNGKey(0)
    n_feature = 32
    batch = 48  # small, but enough rows to exercise several tiles below

    k_x, k_w, k_b, k_x2 = jax.random.split(key, 4)
    # Deterministic init matching nn.Linear(n_feature, 1, bias=True) shapes.
    bound = 1.0 / (n_feature ** 0.5)
    w = jax.random.uniform(
        k_w, (1, n_feature), dtype=jnp.float32, minval=-bound, maxval=bound
    )  # torch weight layout (out=1, in=n_feature)
    b = jax.random.uniform(
        k_b, (1,), dtype=jnp.float32, minval=-bound, maxval=bound
    )[0]
    x = jax.random.normal(k_x, (batch, n_feature), dtype=jnp.float32)
    y_ref = x @ w.T + b

    # 1) Multiple exact tiles (grid = 3).
    y = jax.block_until_ready(linear_forward(x, w, b, block_rows=16))
    assert y.shape == (batch, 1)
    assert jnp.allclose(y, y_ref, atol=1e-5, rtol=1e-5)

    # 2) Ragged last block (grid = 2, last block half out-of-bounds; masked writes).
    y_rag = jax.block_until_ready(linear_forward(x, w, b, block_rows=32))
    assert jnp.allclose(y_rag, y_ref, atol=1e-5, rtol=1e-5)

    # 3) Automatic (byte-budgeted, lane-padding-aware) tile sizing.
    y_auto = jax.block_until_ready(linear_forward(x, w, b))
    assert jnp.allclose(y_auto, y_ref, atol=1e-5, rtol=1e-5)

    # 4) Larger ragged batch with auto tiling (grid >= 4, ragged last block).
    x_big = jax.random.normal(k_x2, (1000, n_feature), dtype=jnp.float32)
    y_big = jax.block_until_ready(linear_forward(x_big, w, b))
    y_big_ref = x_big @ w.T + b
    assert jnp.allclose(y_big, y_big_ref, atol=1e-5, rtol=1e-5)

    print("KERNEL_OK")
</pallas_src>

<mosaic_0001>
module attributes {stable_mosaic.version = 11 : i64} {
  func.func @_linear_kernel(%arg0: i32, %arg1: memref<16x32xf32, #tpu.memory_space<vmem>>, %arg2: memref<32x1xf32, #tpu.memory_space<vmem>>, %arg3: memref<1x1xf32, #tpu.memory_space<smem>>, %arg4: memref<16x1xf32, #tpu.memory_space<vmem>>) attributes {dimension_semantics = [#tpu.dimension_semantics<parallel>], iteration_bounds = array<i64: 3>, scalar_prefetch = 0 : i64, scratch_operands = 0 : i64, tpu.core_type = #tpu.core_type<tc>, window_params = [{transform_indices = @transform_0, window_bounds = array<i64: 16, 32>}, {pipeline_mode = #tpu.pipeline_mode<synchronous>, transform_indices = @transform_1, window_bounds = array<i64: 32, 1>}, {transform_indices = @transform_2, window_bounds = array<i64: 1, 1>}, {transform_indices = @transform_3, window_bounds = array<i64: 16, 1>}]} {
    %c0 = arith.constant 0 : index
    %c0_0 = arith.constant 0 : index
    %0 = vector.load %arg1[%c0, %c0_0] : memref<16x32xf32, #tpu.memory_space<vmem>>, vector<16x32xf32>
    %c0_1 = arith.constant 0 : index
    %c0_2 = arith.constant 0 : index
    %1 = vector.load %arg2[%c0_1, %c0_2] : memref<32x1xf32, #tpu.memory_space<vmem>>, vector<32x1xf32>
    %cst = arith.constant dense<0.000000e+00> : vector<16x1xf32>
    %2 = tpu.matmul %0, %1, %cst {dimension_numbers = #tpu.dot_dimension_numbers<[1], [0], [0], [1], [0, 0, 1, 1], [], []>} : vector<16x32xf32>, vector<32x1xf32>, vector<16x1xf32> -> vector<16x1xf32>
    %c0_3 = arith.constant 0 : index
    %c0_4 = arith.constant 0 : index
    %3 = memref.load %arg3[%c0_3, %c0_4] : memref<1x1xf32, #tpu.memory_space<smem>>
    %4 = vector.broadcast %3 : f32 to vector<16x1xf32>
    %5 = arith.addf %2, %4 : vector<16x1xf32>
    %c0_5 = arith.constant 0 : index
    %c0_6 = arith.constant 0 : index
    %6 = vector.load %arg4[%c0_5, %c0_6] : memref<16x1xf32, #tpu.memory_space<vmem>>, vector<16x1xf32>
    tpu.vector_store %arg4[%c0_5, %c0_6], %5 {strides = array<i32>} : memref<16x1xf32, #tpu.memory_space<vmem>>, vector<16x1xf32>,
    return
  }
  func.func @transform_0(%arg0: i32) -> (i32, i32) {
    %c0_i32 = arith.constant 0 : i32
    %c0_i32_0 = arith.constant 0 : i32
    return %arg0, %c0_i32 : i32, i32
  }
  func.func @transform_1(%arg0: i32) -> (i32, i32) {
    %c0_i32 = arith.constant 0 : i32
    %c0_i32_0 = arith.constant 0 : i32
    %c0_i32_1 = arith.constant 0 : i32
    return %c0_i32, %c0_i32_0 : i32, i32
  }
  func.func @transform_2(%arg0: i32) -> (i32, i32) {
    %c0_i32 = arith.constant 0 : i32
    %c0_i32_0 = arith.constant 0 : i32
    %c0_i32_1 = arith.constant 0 : i32
    return %c0_i32, %c0_i32_0 : i32, i32
  }
  func.func @transform_3(%arg0: i32) -> (i32, i32) {
    %c0_i32 = arith.constant 0 : i32
    %c0_i32_0 = arith.constant 0 : i32
    return %arg0, %c0_i32 : i32, i32
  }
}

</mosaic_0001>

<bundles_post_ra>
// kernel: tpu_custom_call.1
= control target key start
LH: loop header
LB: loop body
LE: loop exit
PB: predicated region body
PF: predicated region fallthrough
CT: control target
= control target key end

     0   :  { %s401_s14 = smov 0   ;;  %s430_s0 = inlined_call_operand.vmem [shape: f32[48,32], index: 0, kind: input, shape index: {}]   ;;  %s431_s1 = inlined_call_operand.vmem [shape: f32[32,1], index: 1, kind: input, shape index: {}]   ;;  %s432_s2 = inlined_call_operand.<no memory space> [shape: f32[1,1], index: 2, kind: input, shape index: {}]   ;;  %s433_s3 = inlined_call_operand.vmem [shape: f32[48,1], index: 3, kind: output, shape index: {}]  }
   0x1   :  { %8 = sst [smem:[#allocation2]] %s432_s2 }
   0x2 LB: > { %s324_s15 = sadd.s32 4294967295, %s376_s14   ;;  %p328_p0 = scmp.ge.s32.totalorder %s376_s14, 1  ;;  %s376_s14 = sphi %s401_s14, %s14_s14  }
   0x3   : > { %p139_p1 = scmp.lt.s32.totalorder %s376_s14, 4 }
   0x5   : > { %p140_p2 = pnand %p328_p0, %p139_p1 }
   0x6   : > { %v177_v0 = vld [vmem:[%s431_s1] sm:$0xff] (!%p140_p2)  ;;  %v178_v1 = vld [vmem:[%s431_s1 + $0x8] sm:$0xff] (!%p140_p2)  ;;  %v179_v2 = vld [vmem:[%s431_s1 + $0x10] sm:$0xff] (!%p140_p2)  ;;  %s329_s21 = sshll.u32 (!%p140_p2), %s324_s15, 1  ;;  %vm183_vm0 = vcmask (!%p140_p2), 261120   ;;  %s181_s28 = sld [smem:[#allocation2]] (!%p140_p2) }
   0x7   : > { %143 = sbr.rel (%p140_p2) target bundleno = 235 (0xeb), region = 32  ;;  %v354_v3 = vpack.c.bf16 (!%p140_p2), %v178_v1, %v177_v0  ;;  %v180_v4 = vld [vmem:[%s431_s1 + $0x18] sm:$0xff] (!%p140_p2)  ;;  %p164_p3 = scmp.lt.s32.totalorder (!%p140_p2), %s329_s21, 5  ;;  %vm265_vm1 = vcmask (!%p140_p2), 7168  }
   0x8   : > { %v358_v5 = vpack.c.bf16 (!%p140_p2), %v180_v4, %v179_v2 }
   0x9   : > { %355 = vmatprep.subr.bf16.mxu0 (!%p140_p2), %v354_v3 }
   0xa   : > { %357 = vmatpush3.bf16.msra.mxu0 (!%p140_p2), %v354_v3 }
   0xb   : > { %359 = vmatprep.subr.bf16.mxu0 (!%p140_p2), %v358_v5 }
   0xc   : > { %v182_v8 = vstv (!%p140_p2), %s181_s28 }
   0xe   : > { %s435_s21 = smov (!%p164_p3, %s329_s21), 5  ;;  %361 = vmatpush3.bf16.msra.mxu0 %v358_v5 }
   0xf   : > { %s330_s24 = sshll.u32 %s435_s21, 3 }
  0x10   : > { %s167_s27 = scalar_lea.vmem %s430_s0, %s330_s24  ;;  %s173_s4 = scalar_lea.vmem %s433_s3, %s330_s24 }
  0x11   : > { %v175_v6 = vld [vmem:[%s167_s27] sm:$0xff]  ;;  %v176_v7 = vld [vmem:[%s167_s27 + $0x8] sm:$0xff] }
  0x12   : > { %351 = vmatprep.mubr.msk.f32.mxu0 %vm183_vm0, %v175_v6 }
  0x13   : > { %352 = vmatmul.mubr.msk.f32.vlgmr.msra.gmra.mrb[0].mxu0 %vm183_vm0, %v176_v7 }
  0xe6   : > { %v353_v9 = vpop.f32.mrb[0].mxu0 }
  0xe7   : > { %v256_v10 = vpop.f32.mrb[1].mxu0  ;;  %v262_v12 = vadd.f32 %v353_v9, %v182_v8 }
  0xe8   : > { %v257_v11 = vadd.f32 %v256_v10, %v182_v8 }
  0xe9   : > { %267 = vst.msk [vmem:[%s173_s4 + $0x8] sm:$0xff] %vm265_vm1, %v262_v12 }
  0xea   : > { %266 = vst.msk [vmem:[%s173_s4] sm:$0xff] %vm265_vm1, %v257_v11 }
  0xeb PF: > { %s14_s14 = sadd.s32 1, %s376_s14  }
  0xec   : > { %p11_p4 = scmp.ge.s32.totalorder %s14_s14, 5  }
  0xee   :  { %13 = sbr.rel (!%p11_p4) target bundleno = 2 (0x2), region = 62 }

</bundles_post_ra>
